<compile_context>
chip_gen: v6e
topology: v6e:2x2x1
jax: 0.10.0
libtpu: 0.0.40
codegen_flags: <defaults>
</compile_context>

<pallas_src>
import functools

import numpy as np

import jax
import jax.numpy as jnp
from jax.experimental import pallas as pl
from jax.experimental.pallas import tpu as pltpu


def _round_up(x, m):
    return pl.cdiv(x, m) * m


def _embed_kernel(idx_ref, table_ref, out_ref):
    # idx_ref:   [TB, C]    int32  indices already offset into the stacked table
    # table_ref: [Vp, C*D]  f32    block-diagonal table (see module docstring)
    # out_ref:   [TB, C*D]  out_dtype  lane-dense concat of the C embeddings/row
    idx = idx_ref[...]                                            # [TB, C]
    table = table_ref[...]                                        # [Vp, C*D]
    tb, c = idx.shape
    vp = table.shape[0]

    # One-hot over the stacked vocab with C ones per batch row (column vocab
    # ranges are disjoint after offsetting).  Static loop over C keeps vreg
    # pressure bounded and builds a single [TB, Vp] operand.
    iota_v = jax.lax.broadcasted_iota(jnp.int32, (tb, vp), 1)     # [TB, Vp]
    hit = iota_v == idx[:, 0:1]
    for ci in range(1, c):
        hit = hit | (iota_v == idx[:, ci:ci + 1])
    onehot = hit.astype(table.dtype)                              # [TB, Vp]

    # Block-diagonal matmul = gather + place column c at lanes [c*D, (c+1)*D):
    #   out[b, c*D + d] = table[idx[b, c], d]
    # Accumulate in f32 (exact: exactly one non-zero term per output element),
    # round only at the store if out_dtype is narrower.
    acc = jnp.dot(onehot, table, preferred_element_type=jnp.float32)
    out_ref[...] = acc.astype(out_ref.dtype)


def _build_blockdiag_table(big_table, offsets, num_cols):
    """[V, D] stacked table -> [Vp, C*D] block-diagonal table (Vp = V rounded to 8).

    `offsets` are Python ints, ascending, starting at 0 (asserted).  Runs ONCE
    at init (hoisted out of the per-call forward).
    """
    V, D = big_table.shape
    offsets = [int(o) for o in offsets]
    assert offsets[0] == 0, "offsets must start at 0"
    assert all(offsets[i] < offsets[i + 1] for i in range(len(offsets) - 1)), \
        "offsets must be strictly ascending (column order == stacking order)"

    Vp = max(_round_up(V, 8), 8)
    row_ids = np.arange(Vp)
    # Column owning each stacked-vocab row (pad rows past V land in the last
    # column but are never addressed by valid indices).
    col_of_row = np.searchsorted(np.asarray(offsets), row_ids, side="right") - 1
    lane_col = np.arange(num_cols * D) // D                        # [C*D]

    padded = jnp.pad(big_table, ((0, Vp - V), (0, 0)))             # [Vp, D]
    tiled = jnp.tile(padded, (1, num_cols))                        # [Vp, C*D]
    mask = jnp.asarray(col_of_row[:, None] == lane_col[None, :])   # [Vp, C*D]
    return jnp.where(mask, tiled, 0.0).astype(jnp.float32)


@functools.partial(jax.jit, static_argnames=("tile_b", "out_dtype"))
def static_embedding_forward(x, bd_table, offsets, *, tile_b=1024,
                             out_dtype=jnp.float32):
    """
    x:        [B, C]     int32   raw per-column indices
    bd_table: [Vp, C*D]  float32 block-diagonal table (from _build_blockdiag_table)
    offsets:  [C]        int32   vocab offset of each column inside the stacked table
    returns:  [B, C*D]   out_dtype (== torch.cat([emb_c(x[:, c]) for c], dim=1))
    """
    B, C = x.shape
    Vp, CD = bd_table.shape

    if B == 0:  # static shape -> resolved at trace time
        return jnp.zeros((0, CD), out_dtype)

    idx = x.astype(jnp.int32) + offsets[None, :].astype(jnp.int32)   # [B, C]

    # ---- batch tiling ---------------------------------------------------
    # Sublane-aligned tile; default 1024 rows (>=512 recommended) so the kernel
    # runs at the HBM-write roofline; clamp to the padded batch for small B.
    tile_b = max(8, _round_up(int(tile_b), 8))
    tb = min(tile_b, _round_up(B, 8))
    # v7x megacore: keep >= 2 "parallel" grid steps once the batch is big
    # enough to split, so both TensorCores get work (no effect on v5e/v6e).
    if B > 512:
        tb = min(tb, max(512, _round_up(pl.cdiv(B, 2), 8)))

    grid_b = pl.cdiv(B, tb)
    Bp = grid_b * tb
    # Pad index rows so every INPUT block read is in-bounds (pad rows use the
    # valid stacked index 0).  The ragged last OUTPUT block is clipped by
    # Pallas, so no out[:B] slice copy is needed.
    idx_p = jnp.pad(idx, ((0, Bp - B), (0, 0)))

    out_bytes = jnp.dtype(out_dtype).itemsize
    cost = pl.CostEstimate(
        flops=2 * Bp * Vp * CD,
        transcendentals=0,
        bytes_accessed=Bp * C * 4 + Vp * CD * 4 + B * CD * out_bytes,
    )

    # NOTE: the idx BlockSpec (tb, C) pads lanes to 128 in VMEM (~32x inflation
    # at C=4).  Fine at these sizes; if tile_b is pushed to 4K+ or C grows,
    # pass idx transposed as [C, B] with block (C, tb) (lane-dense along batch)
    # and transpose in-kernel on the otherwise-idle XLU slot.
    out = pl.pallas_call(
        _embed_kernel,
        out_shape=jax.ShapeDtypeStruct((B, CD), out_dtype),
        grid_spec=pltpu.PrefetchScalarGridSpec(
            num_scalar_prefetch=0,
            grid=(grid_b,),
            in_specs=[
                # index tile (full C)
                pl.BlockSpec((tb, C), lambda i: (i, 0)),
                # resident block-diagonal table: constant index_map, single buffer
                pl.BlockSpec((Vp, CD), lambda i: (0, 0),
                             pipeline_mode=pl.Buffered(1)),
            ],
            # lane-dense output (CD multiple of 128 -> unmasked stores)
            out_specs=pl.BlockSpec((tb, CD), lambda i: (i, 0)),
        ),
        compiler_params=pltpu.CompilerParams(
            dimension_semantics=("parallel",),
            vmem_limit_bytes=32 * 1024 * 1024,
        ),
        cost_estimate=cost,
    )(idx_p, bd_table)

    return out


def make_static_embedding_params(num_unique_values, embedding_dim, key):
    """Deterministically init one N(0,1) table per column (like nn.Embedding),
    stack them, and precompute the block-diagonal lookup table (one-time)."""
    cols = list(num_unique_values.keys())
    tables = []
    offsets_py = []
    off = 0
    for col in cols:
        vocab = int(num_unique_values[col])
        key, sub = jax.random.split(key)
        tables.append(jax.random.normal(sub, (vocab, embedding_dim), jnp.float32))
        offsets_py.append(off)
        off += vocab
    big_table = jnp.concatenate(tables, axis=0)                  # [V_total, D]
    # Hoisted out of the per-call forward (perf review): built once here.
    bd_table = _build_blockdiag_table(big_table, offsets_py, len(cols))
    offsets = jnp.asarray(offsets_py, dtype=jnp.int32)           # [C]
    return big_table, bd_table, offsets, cols


def reference_forward(x, big_table, offsets):
    """Pure-JAX reference of the PyTorch forward."""
    B, C = x.shape
    idx = x + offsets[None, :]
    emb = big_table[idx.reshape(-1)]                             # [B*C, D]
    return emb.reshape(B, -1)


if __name__ == "__main__":
    key = jax.random.PRNGKey(0)

    # Small synthetic config consistent with the module's __init__.
    embedding_dim = 32
    num_unique_values = {"gender": 3, "race": 6, "insurance": 5, "marital": 4}
    B = 2
    C = len(num_unique_values)

    big_table, bd_table, offsets, cols = make_static_embedding_params(
        num_unique_values, embedding_dim, key)

    # Deterministic integer inputs: x[:, i] in [0, vocab_i)
    key, sub = jax.random.split(key)
    vocabs = jnp.asarray([num_unique_values[c] for c in cols], dtype=jnp.int32)
    x = (jax.random.randint(sub, (B, C), 0, 10_000, dtype=jnp.int32) % vocabs[None, :])

    out = static_embedding_forward(x, bd_table, offsets)
    out = jax.block_until_ready(out)

    ref = reference_forward(x, big_table, offsets)
    assert out.shape == (B, C * embedding_dim), out.shape
    assert jnp.allclose(out, ref, atol=1e-5, rtol=1e-5), "mismatch vs reference"

    print("KERNEL_OK")
</pallas_src>

<mosaic_0001>
module attributes {stable_mosaic.version = 11 : i64} {
  func.func @_embed_kernel(%arg0: i32, %arg1: memref<8x4xi32, #tpu.memory_space<vmem>>, %arg2: memref<24x128xf32, #tpu.memory_space<vmem>>, %arg3: memref<8x128xf32, #tpu.memory_space<vmem>>) attributes {dimension_semantics = [#tpu.dimension_semantics<parallel>], iteration_bounds = array<i64: 1>, scalar_prefetch = 0 : i64, scratch_operands = 0 : i64, tpu.core_type = #tpu.core_type<tc>, window_params = [{transform_indices = @transform_0, window_bounds = array<i64: 8, 4>}, {pipeline_mode = #tpu.pipeline_mode<synchronous>, transform_indices = @transform_1, window_bounds = array<i64: 24, 128>}, {transform_indices = @transform_2, window_bounds = array<i64: 8, 128>}]} {
    %c0 = arith.constant 0 : index
    %c0_0 = arith.constant 0 : index
    %0 = vector.load %arg1[%c0, %c0_0] : memref<8x4xi32, #tpu.memory_space<vmem>>, vector<8x4xi32>
    %c0_1 = arith.constant 0 : index
    %c0_2 = arith.constant 0 : index
    %1 = vector.load %arg2[%c0_1, %c0_2] : memref<24x128xf32, #tpu.memory_space<vmem>>, vector<24x128xf32>
    %2 = tpu.iota {dimensions = array<i32: 1>} : vector<8x24xi32>
    %3 = vector.extract_strided_slice %0 {offsets = [0, 0], sizes = [8, 1], strides = [1, 1]} : vector<8x4xi32> to vector<8x1xi32>
    %4 = vector.broadcast %3 : vector<8x1xi32> to vector<8x24xi32>
    %5 = arith.cmpi eq, %2, %4 : vector<8x24xi32>
    %6 = vector.extract_strided_slice %0 {offsets = [0, 1], sizes = [8, 1], strides = [1, 1]} : vector<8x4xi32> to vector<8x1xi32>
    %7 = vector.broadcast %6 : vector<8x1xi32> to vector<8x24xi32>
    %8 = arith.cmpi eq, %2, %7 : vector<8x24xi32>
    %9 = arith.ori %5, %8 : vector<8x24xi1>
    %10 = vector.extract_strided_slice %0 {offsets = [0, 2], sizes = [8, 1], strides = [1, 1]} : vector<8x4xi32> to vector<8x1xi32>
    %11 = vector.broadcast %10 : vector<8x1xi32> to vector<8x24xi32>
    %12 = arith.cmpi eq, %2, %11 : vector<8x24xi32>
    %13 = arith.ori %9, %12 : vector<8x24xi1>
    %14 = vector.extract_strided_slice %0 {offsets = [0, 3], sizes = [8, 1], strides = [1, 1]} : vector<8x4xi32> to vector<8x1xi32>
    %15 = vector.broadcast %14 : vector<8x1xi32> to vector<8x24xi32>
    %16 = arith.cmpi eq, %2, %15 : vector<8x24xi32>
    %17 = arith.ori %13, %16 : vector<8x24xi1>
    %18 = arith.extui %17 : vector<8x24xi1> to vector<8x24xi32>
    %19 = arith.sitofp %18 : vector<8x24xi32> to vector<8x24xf32>
    %cst = arith.constant dense<0.000000e+00> : vector<8x128xf32>
    %20 = tpu.matmul %19, %1, %cst {dimension_numbers = #tpu.dot_dimension_numbers<[1], [0], [0], [1], [0, 0, 1, 1], [], []>} : vector<8x24xf32>, vector<24x128xf32>, vector<8x128xf32> -> vector<8x128xf32>
    %c0_3 = arith.constant 0 : index
    %c0_4 = arith.constant 0 : index
    %21 = vector.load %arg3[%c0_3, %c0_4] : memref<8x128xf32, #tpu.memory_space<vmem>>, vector<8x128xf32>
    tpu.vector_store %arg3[%c0_3, %c0_4], %20 {strides = array<i32>} : memref<8x128xf32, #tpu.memory_space<vmem>>, vector<8x128xf32>,
    return
  }
  func.func @transform_0(%arg0: i32) -> (i32, i32) {
    %c0_i32 = arith.constant 0 : i32
    %c0_i32_0 = arith.constant 0 : i32
    return %arg0, %c0_i32 : i32, i32
  }
  func.func @transform_1(%arg0: i32) -> (i32, i32) {
    %c0_i32 = arith.constant 0 : i32
    %c0_i32_0 = arith.constant 0 : i32
    %c0_i32_1 = arith.constant 0 : i32
    return %c0_i32, %c0_i32_0 : i32, i32
  }
  func.func @transform_2(%arg0: i32) -> (i32, i32) {
    %c0_i32 = arith.constant 0 : i32
    %c0_i32_0 = arith.constant 0 : i32
    return %arg0, %c0_i32 : i32, i32
  }
}

</mosaic_0001>

<bundles_post_ra>
// kernel: static_embedding_forward.1
= control target key start
LH: loop header
LB: loop body
LE: loop exit
PB: predicated region body
PF: predicated region fallthrough
CT: control target
= control target key end

     0   :  { %7 = vsyncpa [#allocation3], 0  ;;  %s257_s0 = inlined_call_operand.vmem [shape: s32[8,4], index: 0, kind: input, shape index: {}]   ;;  %s258_s1 = inlined_call_operand.hbm [shape: f32[24,128], index: 1, kind: input, shape index: {}]   ;;  %s259_s2 = inlined_call_operand.hbm [shape: f32[2,128], index: 2, kind: output, shape index: {}]  }
   0x1   :  { %8 = vsyncpa [#allocation4], 0  ;;  %s221_s9 = smov [#allocation2]  }
   0x2   :  { %s16_s10 = sshll.u32 %s221_s9, 4  ;;  %s17_s10 = int_to_ptr.vmem [resolvable:$true] %s16_s10 }
   0x3   :  { %s185_s11 = scalar_lea.vmem %s17_s10, 384  ;;  %p190_p1 = scmp.lt.s32.totalorder %s17_s10, %s17_s10 }
   0x4   :  { %p186_p0 = scmp.ne.s32.totalorder %s17_s10, %s185_s11  ;;  %p191_p2 = scmp.lt.s32.totalorder %s185_s11, %s185_s11 }
   0x6   :  { %p192_p3 = por %p191_p2, %p190_p1 }
   0x8   :  { %p193_p4 = pnand %p192_p3, %p186_p0 }
   0xa   :  { %196 = shalt.err (!%p193_p4)
}
   0xb   :  { %s222_s12 = smov 128   ;;  %s223_s13 = smov 8  }
   0xc   :  { %22 = dma.hbm_to_vmem [thread:$0]  %s258_s1, 384, %s17_s10, [#allocation3], %s222_s12, %s222_s12, %s223_s13  }
   0xd   :  { %217 = dma.done.wait [#allocation3], 384  }
   0xe   :  { %218 = vsyncadd [#allocation3], 4294966912  ;;  %v224_v0 = vmov 0   ;;  %v225_v1 = vmov 2   ;;  %v226_v2 = vmov 0.0   ;;  %v26_v3 = vld [vmem:[%s257_s0] sm:$0xff]  ;;  %v30_v9 = vlaneseq }
   0xf   :  { %172 = vset.pattern.permute.xlu0 %v224_v0  ;;  %174 = vset.pattern.permute.xlu1 %v225_v1  ;;  %v29_v4 = vld [vmem:[#allocation2 + $0x10] sm:$0xff]  ;;  %v28_v5 = vld [vmem:[#allocation2 + $0x8] sm:$0xff]  ;;  %v227_v6 = vmov 1   ;;  %v228_v7 = vmov 3   ;;  %v27_v8 = vld [vmem:[#allocation2] sm:$0xff]  ;;  %vm229_vm0 = vmmov 0  }
  0x10   :  { %151 = vmatprep.subr.mxu0 %v226_v2  ;;  %33 = vperm.xlu0 %172, %v26_v3   ;;  %v31_v12 = vand.u32 127, %v30_v9  ;;  %vm53_vm7 = vcmask 195584  }
  0x11   :  { %42 = vperm.xlu1 %174, %v26_v3   ;;  %152 = vmatpush3.msra.mxu0 %v29_v4 }
  0x12   :  { %153 = vmatprep.subr.mxu0 %v226_v2  ;;  %157 = vmatprep.mubr.msk.f32.mxu0 %vm229_vm0, %v226_v2 }
  0x13   :  { %154 = vmatpush3.msra.mxu0 %v28_v5 }
  0x14   :  { %173 = vset.pattern.permute.xlu0 %v227_v6  ;;  %155 = vmatprep.subr.mxu0 %v226_v2 }
  0x15   :  { %175 = vset.pattern.permute.xlu1 %v228_v7  ;;  %37 = vperm.xlu0 %173, %v26_v3  }
  0x16   :  { %47 = vperm.xlu1 %175, %v26_v3   ;;  %156 = vmatpush3.msra.mxu0 %v27_v8 }
  0x19   :  { %176 = vset.pattern.permute.xlu0 %v228_v7 }
  0x8b   :  { %v34_v10 = vpop.permute.xlu0 %33 }
  0x8c   :  { %v43_v11 = vpop.permute.xlu1 %42  ;;  %vm35_vm1 = vcmp.eq.s32.totalorder %v31_v12, %v34_v10 }
  0x8d   :  { %vm44_vm4 = vcmp.eq.s32.totalorder %v31_v12, %v43_v11 }
  0x90   :  { %v38_v13 = vpop.permute.xlu0 %37 }
  0x91   :  { %v48_v14 = vpop.permute.xlu1 %47  ;;  %vm39_vm2 = vcmp.eq.s32.totalorder %v31_v12, %v38_v13 }
  0x92   :  { %vm49_vm3 = vcmp.eq.s32.totalorder %v31_v12, %v48_v14  ;;  %vm40_vm5 = vmor %vm35_vm1, %vm39_vm2 }
  0x93   :  { %vm45_vm6 = vmor %vm40_vm5, %vm44_vm4 }
  0x94   :  { %vm50_vm8 = vmor %vm45_vm6, %vm49_vm3 }
  0x95   :  { %v145_v15 = vsel %vm50_vm8, 1.0, %v226_v2 }
  0x96   :  { %158 = vmatmul.mubr.msk.f32.vlgmr.msra.gmra.mxu0 %vm53_vm7, %v145_v15 }
 0x156   :  { %v123_v16 = vpop.f32.mrf.mxu0 }
 0x157   :  { %127 = vst [vmem:[#allocation5] sm:$0xff] %v123_v16 }
 0x158   :  { %v159_v17 = vpop.f32.mrf.mxu0 }
 0x159   :  { %132 = vsyncadd [#allocation4], 96  ;;  %s230_s0 = smov [#allocation5]  }
 0x15a   :  { %s133_s1 = sshll.u32 %s230_s0, 4  ;;  %s134_s1 = int_to_ptr.vmem [resolvable:$true] %s133_s1 }
 0x15b   :  { %s197_s18 = scalar_lea.vmem %s134_s1, 32  ;;  %s201_s19 = scalar_lea.vmem %s134_s1, 128 }
 0x15c   :  { %p198_p5 = scmp.ne.s32.totalorder %s134_s1, %s197_s18  ;;  %p202_p6 = scmp.lt.s32.totalorder %s134_s1, %s134_s1 }
 0x15d   :  { %p203_p7 = scmp.lt.s32.totalorder %s201_s19, %s197_s18 }
 0x15f   :  { %p204_p8 = por %p203_p7, %p202_p6 }
 0x161   :  { %p205_p9 = pnand %p204_p8, %p198_p5 }
 0x163   :  { %208 = shalt.err (!%p205_p9)
}
 0x164   :  { %s231_s20 = smov 32   ;;  %s232_s21 = smov 2  }
 0x165   :  { %139 = dma.vmem_to_hbm [thread:$0]  %s134_s1, 32, %s259_s2, [#allocation4], %s231_s20, %s231_s20, %s232_s21  }
 0x166   :  { %219 = dma.done.wait [#allocation4], 128  }
 0x167   :  { %220 = vsyncadd [#allocation4], 4294967168 }
 0x168   :  { %143 = vsyncpa [#allocation3], 1 }
 0x169   :  { %144 = vsyncpa [#allocation4], 1 }

</bundles_post_ra>
